<compile_context>
chip_gen: v6e
topology: v6e:2x2x1
jax: 0.10.0
libtpu: 0.0.40
codegen_flags: <defaults>
</compile_context>

<pallas_src>
import math

import jax
import jax.numpy as jnp
from jax import lax
from jax.experimental import pallas as pl
from jax.experimental.pallas import tpu as pltpu

d_k = d_v = 64


def _make_sdpa_kernel(scale, return_attn, approx_recip):
    def kernel(q_ref, k_ref, v_ref, pad_ref, ctx_ref, *rest):
        # q_ref: (Hb, Tq, Dk)   k_ref: (Hb, S, Dk)   v_ref: (Hb, S, Dv)
        # pad_ref: (Hb, 1, S) int32, nonzero == masked key position.
        q = q_ref[...]
        q = q * jnp.asarray(scale, q.dtype)          # fold 1/sqrt(d_k) into Q tile

        # scores = Q @ K^T — contract the feature axes directly (no K transpose).
        scores = lax.dot_general(
            q, k_ref[...],
            dimension_numbers=(((2,), (2,)), ((0,), (0,))),
            preferred_element_type=jnp.float32)       # (Hb, Tq, S) fp32

        pad = pad_ref[...]                            # (Hb, 1, S)
        scores = jnp.where(pad != 0, jnp.float32(-1000000000.0), scores)

        # Numerically stable softmax over keys.
        m = jnp.max(scores, axis=-1, keepdims=True)
        e = jnp.exp(scores - m)
        denom = jnp.sum(e, axis=-1, keepdims=True)
        attn = e * pl.reciprocal(denom, approx=approx_recip)

        # context = attn @ V  (probabilities cast to the compute dtype → bf16 MXU).
        p = attn.astype(v_ref.dtype)
        ctx = lax.dot_general(
            p, v_ref[...],
            dimension_numbers=(((2,), (1,)), ((0,), (0,))),
            preferred_element_type=jnp.float32)       # (Hb, Tq, Dv)

        ctx_ref[...] = ctx.astype(ctx_ref.dtype)
        if return_attn:
            rest[0][...] = attn.astype(rest[0].dtype)

    return kernel


def _pick_block_heads(bh, target):
    """Largest divisor of bh <= target, preferring an even grid extent."""
    divs = [d for d in range(1, min(bh, max(1, target)) + 1) if bh % d == 0]
    even = [d for d in divs if (bh // d) % 2 == 0]
    return max(even) if even else max(divs)


def _pick_block_q(s, target):
    """Query tile: full S if it fits, else the largest multiple-of-8 divisor."""
    if s <= target:
        return s
    divs = [d for d in range(8, min(s, target) + 1, 8) if s % d == 0]
    return max(divs) if divs else s


def _to_key_pad(attn_pad, B, H, S):
    """Reduce the attention pad mask to a per-key vector [B*H, 1, S] (int32).

    Accepts [B, S], [B, 1|H, S], or the module's [B, 1|H, 1|S, S] form.  The
    4-D form is BERT's broadcast of a key-padding mask (constant along the
    query axis), so only the key axis is kept.
    """
    a = jnp.asarray(attn_pad)
    if a.ndim == 2:
        a = jnp.broadcast_to(a[:, None, :], (B, H, S))
    elif a.ndim == 3:
        a = jnp.broadcast_to(a, (B, H, S))
    elif a.ndim == 4:
        # TODO(synk): a truly per-query dense mask (not a key-padding broadcast)
        # would need a dense-mask kernel variant.
        a = jnp.broadcast_to(a, (B, H, a.shape[2], S))[:, :, 0, :]
    else:
        raise ValueError(f"unsupported attn_pad shape {a.shape}")
    return a.reshape(B * H, 1, S).astype(jnp.int32)


def scaled_dot_product_attention(Q, K, V, attn_pad, *,
                                 return_attn=True,
                                 compute_dtype=jnp.bfloat16,
                                 attn_dtype=jnp.bfloat16,
                                 block_heads=8,
                                 block_q=512):
    """Pallas TPU ScaledDotProductAttention.

    Q, K: [B, H, S, d_k]; V: [B, H, S, d_v]; attn_pad: key padding mask
    (True/nonzero == masked).  Returns (context [B,H,S,d_v] in Q.dtype,
    attn [B,H,S,S] in attn_dtype), or only context when return_attn=False.
    """
    B, H, S, Dk = Q.shape
    Dv = V.shape[-1]
    BH = B * H

    cdt = jnp.dtype(compute_dtype)
    q = Q.reshape(BH, S, Dk).astype(cdt)
    k = K.reshape(BH, S, Dk).astype(cdt)
    v = V.reshape(BH, S, Dv).astype(cdt)
    key_pad = _to_key_pad(attn_pad, B, H, S)

    hb = _pick_block_heads(BH, block_heads)
    tq = _pick_block_q(S, block_q)
    grid = (BH // hb, S // tq)

    kernel = _make_sdpa_kernel(
        scale=1.0 / math.sqrt(Dk),
        return_attn=return_attn,
        approx_recip=(cdt == jnp.dtype(jnp.bfloat16)),
    )

    ctx_sds = jax.ShapeDtypeStruct((BH, S, Dv), Q.dtype)
    ctx_spec = pl.BlockSpec((hb, tq, Dv), lambda i, j: (i, j, 0))
    if return_attn:
        out_shape = (ctx_sds,
                     jax.ShapeDtypeStruct((BH, S, S), jnp.dtype(attn_dtype)))
        out_specs = [ctx_spec, pl.BlockSpec((hb, tq, S), lambda i, j: (i, j, 0))]
    else:
        out_shape = ctx_sds
        out_specs = ctx_spec

    grid_spec = pltpu.PrefetchScalarGridSpec(
        num_scalar_prefetch=0,
        grid=grid,
        in_specs=[
            pl.BlockSpec((hb, tq, Dk), lambda i, j: (i, j, 0)),   # Q (query-tiled)
            pl.BlockSpec((hb, S, Dk), lambda i, j: (i, 0, 0)),    # K (reused across q tiles)
            pl.BlockSpec((hb, S, Dv), lambda i, j: (i, 0, 0)),    # V
            pl.BlockSpec((hb, 1, S), lambda i, j: (i, 0, 0)),     # per-key pad vector
        ],
        out_specs=out_specs,
    )

    out = pl.pallas_call(
        kernel,
        out_shape=out_shape,
        grid_spec=grid_spec,
        compiler_params=pltpu.CompilerParams(
            dimension_semantics=("parallel", "parallel"),
            vmem_limit_bytes=32 * 1024 * 1024,
        ),
    )(q, k, v, key_pad)

    if return_attn:
        ctx, attn = out
        return ctx.reshape(B, H, S, Dv), attn.reshape(B, H, S, S)
    return out.reshape(B, H, S, Dv)


if __name__ == "__main__":
    B, H, S = 2, 2, 8
    key = jax.random.PRNGKey(0)
    kq, kk, kv = jax.random.split(key, 3)

    Q = jax.random.normal(kq, (B, H, S, d_k), dtype=jnp.float32)
    K = jax.random.normal(kk, (B, H, S, d_k), dtype=jnp.float32)
    V = jax.random.normal(kv, (B, H, S, d_v), dtype=jnp.float32)

    # Standard BERT pad mask: last 2 key positions are padding.  Build the full
    # [B, H, S, S] mask exactly as the PyTorch module receives it; the wrapper
    # reduces it to the per-key vector the kernel consumes.
    key_is_pad = jnp.arange(S) >= (S - 2)
    attn_pad = jnp.broadcast_to(key_is_pad, (B, H, S, S))

    # Plain-JAX fp32 reference (module semantics).
    scores_ref = jnp.einsum("bhqd,bhkd->bhqk", Q, K) / jnp.sqrt(jnp.float32(d_k))
    scores_ref = jnp.where(attn_pad, jnp.float32(-1000000000.0), scores_ref)
    attn_ref = jax.nn.softmax(scores_ref, axis=-1)
    ctx_ref = jnp.einsum("bhqk,bhkd->bhqd", attn_ref, V)

    # 1) Production config: bf16 MXU path, bf16 attention probabilities.
    context, attn = scaled_dot_product_attention(Q, K, V, attn_pad)
    jax.block_until_ready((context, attn))
    assert context.shape == (B, H, S, d_v) and attn.shape == (B, H, S, S)
    assert jnp.allclose(attn.astype(jnp.float32), attn_ref, atol=5e-2), "attn mismatch (bf16)"
    assert jnp.allclose(context.astype(jnp.float32), ctx_ref, atol=2e-1), "context mismatch (bf16)"

    # 2) fp32 compute path: tighter check against the reference.
    ctx32, attn32 = scaled_dot_product_attention(
        Q, K, V, attn_pad, compute_dtype=jnp.float32, attn_dtype=jnp.float32)
    jax.block_until_ready((ctx32, attn32))
    assert jnp.allclose(attn32, attn_ref, atol=2e-3), "attn mismatch (fp32)"
    assert jnp.allclose(ctx32, ctx_ref, atol=2e-2), "context mismatch (fp32)"

    # 3) Optional-output path: no S x S probability writeback.
    ctx_only = scaled_dot_product_attention(Q, K, V, attn_pad, return_attn=False)
    jax.block_until_ready(ctx_only)
    assert ctx_only.shape == (B, H, S, d_v)
    assert jnp.allclose(ctx_only, context, atol=1e-3), "ctx-only mismatch"

    print("KERNEL_OK")
</pallas_src>

<mosaic_0001>
module attributes {stable_mosaic.version = 11 : i64} {
  func.func @kernel(%arg0: i32, %arg1: i32, %arg2: memref<2x8x64xbf16, #tpu.memory_space<vmem>>, %arg3: memref<2x8x64xbf16, #tpu.memory_space<vmem>>, %arg4: memref<2x8x64xbf16, #tpu.memory_space<vmem>>, %arg5: memref<2x1x8xi32, #tpu.memory_space<vmem>>, %arg6: memref<2x8x64xf32, #tpu.memory_space<vmem>>, %arg7: memref<2x8x8xbf16, #tpu.memory_space<vmem>>) attributes {dimension_semantics = [#tpu.dimension_semantics<parallel>, #tpu.dimension_semantics<parallel>], iteration_bounds = array<i64: 2, 1>, scalar_prefetch = 0 : i64, scratch_operands = 0 : i64, tpu.core_type = #tpu.core_type<tc>, window_params = [{transform_indices = @transform_0, window_bounds = array<i64: 2, 8, 64>}, {transform_indices = @transform_1, window_bounds = array<i64: 2, 8, 64>}, {transform_indices = @transform_2, window_bounds = array<i64: 2, 8, 64>}, {transform_indices = @transform_3, window_bounds = array<i64: 2, 1, 8>}, {transform_indices = @transform_4, window_bounds = array<i64: 2, 8, 64>}, {transform_indices = @transform_5, window_bounds = array<i64: 2, 8, 8>}]} {
    %c0 = arith.constant 0 : index
    %c0_0 = arith.constant 0 : index
    %c0_1 = arith.constant 0 : index
    %0 = vector.load %arg2[%c0, %c0_0, %c0_1] : memref<2x8x64xbf16, #tpu.memory_space<vmem>>, vector<2x8x64xbf16>
    %cst = arith.constant 1.250000e-01 : bf16
    %1 = vector.broadcast %cst : bf16 to vector<2x8x64xbf16>
    %2 = arith.mulf %0, %1 : vector<2x8x64xbf16>
    %c0_2 = arith.constant 0 : index
    %c0_3 = arith.constant 0 : index
    %c0_4 = arith.constant 0 : index
    %3 = vector.load %arg3[%c0_2, %c0_3, %c0_4] : memref<2x8x64xbf16, #tpu.memory_space<vmem>>, vector<2x8x64xbf16>
    %cst_5 = arith.constant dense<0.000000e+00> : vector<2x8x8xf32>
    %4 = tpu.matmul %2, %3, %cst_5 {dimension_numbers = #tpu.dot_dimension_numbers<[2], [2], [1], [1], [0, 0, 0, 1, 1, 1], [0], [0]>} : vector<2x8x64xbf16>, vector<2x8x64xbf16>, vector<2x8x8xf32> -> vector<2x8x8xf32>
    %c0_6 = arith.constant 0 : index
    %c0_7 = arith.constant 0 : index
    %c0_8 = arith.constant 0 : index
    %5 = vector.load %arg5[%c0_6, %c0_7, %c0_8] : memref<2x1x8xi32, #tpu.memory_space<vmem>>, vector<2x1x8xi32>
    %c0_i32 = arith.constant 0 : i32
    %6 = vector.broadcast %c0_i32 : i32 to vector<2x1x8xi32>
    %7 = arith.cmpi ne, %5, %6 : vector<2x1x8xi32>
    %cst_9 = arith.constant -1.000000e+09 : f32
    %8 = vector.shape_cast %7 : vector<2x1x8xi1> to vector<2x1x8xi1>
    %9 = vector.broadcast %8 : vector<2x1x8xi1> to vector<2x8x8xi1>
    %10 = vector.broadcast %cst_9 : f32 to vector<2x8x8xf32>
    %11 = arith.select %9, %10, %4 : vector<2x8x8xi1>, vector<2x8x8xf32>
    %cst_10 = arith.constant dense<0xFF800000> : vector<2x8xf32>
    %12 = vector.multi_reduction <maximumf>, %11, %cst_10 [2] : vector<2x8x8xf32> to vector<2x8xf32>
    %13 = vector.shape_cast %12 : vector<2x8xf32> to vector<2x8x1xf32>
    %14 = vector.broadcast %13 : vector<2x8x1xf32> to vector<2x8x8xf32>
    %15 = arith.subf %11, %14 : vector<2x8x8xf32>
    %16 = math.exp %15 : vector<2x8x8xf32>
    %cst_11 = arith.constant dense<0.000000e+00> : vector<2x8xf32>
    %17 = vector.multi_reduction <add>, %16, %cst_11 [2] : vector<2x8x8xf32> to vector<2x8xf32>
    %18 = vector.shape_cast %17 : vector<2x8xf32> to vector<2x8x1xf32>
    %19 = tpu.reciprocal %18 {approx = true} : vector<2x8x1xf32> -> vector<2x8x1xf32>
    %20 = vector.broadcast %19 : vector<2x8x1xf32> to vector<2x8x8xf32>
    %21 = arith.mulf %16, %20 : vector<2x8x8xf32>
    %22 = arith.truncf %21 : vector<2x8x8xf32> to vector<2x8x8xbf16>
    %c0_12 = arith.constant 0 : index
    %c0_13 = arith.constant 0 : index
    %c0_14 = arith.constant 0 : index
    %23 = vector.load %arg4[%c0_12, %c0_13, %c0_14] : memref<2x8x64xbf16, #tpu.memory_space<vmem>>, vector<2x8x64xbf16>
    %cst_15 = arith.constant dense<0.000000e+00> : vector<2x8x64xf32>
    %24 = tpu.matmul %22, %23, %cst_15 {dimension_numbers = #tpu.dot_dimension_numbers<[2], [1], [1], [2], [0, 0, 0, 1, 1, 2], [0], [0]>} : vector<2x8x8xbf16>, vector<2x8x64xbf16>, vector<2x8x64xf32> -> vector<2x8x64xf32>
    %c0_16 = arith.constant 0 : index
    %c0_17 = arith.constant 0 : index
    %c0_18 = arith.constant 0 : index
    %25 = vector.load %arg6[%c0_16, %c0_17, %c0_18] : memref<2x8x64xf32, #tpu.memory_space<vmem>>, vector<2x8x64xf32>
    tpu.vector_store %arg6[%c0_16, %c0_17, %c0_18], %24 {strides = array<i32>} : memref<2x8x64xf32, #tpu.memory_space<vmem>>, vector<2x8x64xf32>,
    %26 = arith.truncf %21 : vector<2x8x8xf32> to vector<2x8x8xbf16>
    %c0_19 = arith.constant 0 : index
    %c0_20 = arith.constant 0 : index
    %c0_21 = arith.constant 0 : index
    %27 = vector.load %arg7[%c0_19, %c0_20, %c0_21] : memref<2x8x8xbf16, #tpu.memory_space<vmem>>, vector<2x8x8xbf16>
    tpu.vector_store %arg7[%c0_19, %c0_20, %c0_21], %26 {strides = array<i32>} : memref<2x8x8xbf16, #tpu.memory_space<vmem>>, vector<2x8x8xbf16>,
    return
  }
  func.func @transform_0(%arg0: i32, %arg1: i32) -> (i32, i32, i32) {
    %c0_i32 = arith.constant 0 : i32
    %c0_i32_0 = arith.constant 0 : i32
    return %arg0, %arg1, %c0_i32 : i32, i32, i32
  }
  func.func @transform_1(%arg0: i32, %arg1: i32) -> (i32, i32, i32) {
    %c0_i32 = arith.constant 0 : i32
    %c0_i32_0 = arith.constant 0 : i32
    %c0_i32_1 = arith.constant 0 : i32
    return %arg0, %c0_i32, %c0_i32_0 : i32, i32, i32
  }
  func.func @transform_2(%arg0: i32, %arg1: i32) -> (i32, i32, i32) {
    %c0_i32 = arith.constant 0 : i32
    %c0_i32_0 = arith.constant 0 : i32
    %c0_i32_1 = arith.constant 0 : i32
    return %arg0, %c0_i32, %c0_i32_0 : i32, i32, i32
  }
  func.func @transform_3(%arg0: i32, %arg1: i32) -> (i32, i32, i32) {
    %c0_i32 = arith.constant 0 : i32
    %c0_i32_0 = arith.constant 0 : i32
    %c0_i32_1 = arith.constant 0 : i32
    return %arg0, %c0_i32, %c0_i32_0 : i32, i32, i32
  }
  func.func @transform_4(%arg0: i32, %arg1: i32) -> (i32, i32, i32) {
    %c0_i32 = arith.constant 0 : i32
    %c0_i32_0 = arith.constant 0 : i32
    return %arg0, %arg1, %c0_i32 : i32, i32, i32
  }
  func.func @transform_5(%arg0: i32, %arg1: i32) -> (i32, i32, i32) {
    %c0_i32 = arith.constant 0 : i32
    %c0_i32_0 = arith.constant 0 : i32
    return %arg0, %arg1, %c0_i32 : i32, i32, i32
  }
}

</mosaic_0001>

<bundles_post_ra>
// kernel: tpu_custom_call.1
= control target key start
LH: loop header
LB: loop body
LE: loop exit
PB: predicated region body
PF: predicated region fallthrough
CT: control target
= control target key end

     0   :  { %s1506_s0 = inlined_call_operand.hbm [shape: bf16[4,8,64], index: 0, kind: input, shape index: {}]   ;;  %s1507_s1 = inlined_call_operand.hbm [shape: bf16[4,8,64], index: 1, kind: input, shape index: {}]   ;;  %s1508_s2 = inlined_call_operand.hbm [shape: bf16[4,8,64], index: 2, kind: input, shape index: {}]   ;;  %s1509_s3 = inlined_call_operand.vmem [shape: s32[4,1,8], index: 3, kind: input, shape index: {}]   ;;  %s1510_s4 = inlined_call_operand.hbm [shape: f32[4,8,64], index: 4, kind: output, shape index: {0}]   ;;  %s1511_s5 = inlined_call_operand.hbm [shape: bf16[4,8,8], index: 5, kind: output, shape index: {1}]  }
   0x1   :  { %1519 = sst [smem:[#allocation20_spill]] %s1507_s1 }
   0x2   :  { %11 = vsyncpa [#allocation3], 0 }
   0x3   :  { %13 = vsyncpa [#allocation3 + $0x1], 0 }
   0x4   :  { %14 = vsyncpa [#allocation6], 0 }
   0x5   :  { %16 = vsyncpa [#allocation6 + $0x1], 0 }
   0x6   :  { %17 = vsyncpa [#allocation4], 0 }
   0x7   :  { %19 = vsyncpa [#allocation4 + $0x1], 0 }
   0x8   :  { %20 = vsyncpa [#allocation10], 0 }
   0x9   :  { %22 = vsyncpa [#allocation10 + $0x1], 0  ;;  %s1233_s18 = smov 0   ;;  %s1235_s19 = smov 0  }
   0xa   :  { %s1237_s20 = smov 0   ;;  %s1239_s21 = smov 0  }
   0xb   :  { %s1241_s22 = smov 0   ;;  %s1243_s23 = smov 0  }
   0xc LB: > { %1520 = sst [smem:[#allocation15_spill]] %s1167_s18  ;;  %s1264_s24 = sadd.s32 4294967295, %s1187_s23   ;;  %s1187_s23 = sphi %s1243_s23, %s28_s23   ;;  %s1183_s22 = sphi %s1241_s22, %s1539_s22   ;;  %s1179_s21 = sphi %s1239_s21, %s1538_s21   ;;  %s1175_s20 = sphi %s1237_s20, %s1542_s20   ;;  %s1171_s19 = sphi %s1235_s19, %s1541_s19   ;;  %s1167_s18 = sphi %s1233_s18, %s1540_s18  }
   0xd   : > { %1521 = sst [smem:[#allocation16_spill]] %s1183_s22  ;;  %s827_s25 = sadd.s32 4294967294, %s1187_s23  }
   0xe   : > { %s40_s26 = sadd.s32 1, %s1183_s22  ;;  %s49_s27 = sadd.s32 1, %s1175_s20 }
   0xf   : > { %p42_p0 = scmp.ge.s32.totalorder %s40_s26, 2  ;;  %p56_p1 = scmp.ne.s32.totalorder %s1175_s20, %s1171_s19 }
  0x10   : > { %p57_p2 = scmp.eq.s32.totalorder %s1187_s23, 0  ;;  %p62_p3 = scmp.ne.s32.totalorder %s1171_s19, %s1167_s18 }
  0x11   : > { %s1544_s26 = smov (%p42_p0, %s40_s26), 0  ;;  %p63_p5 = scmp.eq.s32.totalorder %s1264_s24, 0 }
  0x12   : > { %1522 = sst [smem:[#allocation17_spill]] %s1544_s26  ;;  %p1276_p4 = por %p57_p2, %p56_p1 }
  0x13   : > { %s44_s29 = ssub.s32 %s1183_s22, %s1544_s26  ;;  %p166_p6 = scmp.eq.s32.totalorder %s1264_s24, 1 }
  0x14   : > { %p47_p7 = scmp.eq.s32.totalorder %s44_s29, 0  ;;  %p1284_p8 = por %p63_p5, %p62_p3 }
  0x15   : > { %p1288_p9 = por %p166_p6, %p56_p1  ;;  %p172_p10 = scmp.eq.s32.totalorder %s827_s25, 1 }
  0x16   : > { %s1293_s7 = scalar_select %p47_p7, %s1175_s20, %s49_s27  }
  0x17   : > { %p1295_p11 = por %p172_p10, %p62_p3  ;;  %p922_p13 = scmp.lt.s32.totalorder %s1187_s23, 2 }
  0x18   : > { %1526 = sst [smem:[#allocation18_spill]] %s1293_s7  ;;  %s1512_s9 = sand.u32 1, %s1175_s20  }
  0x19   : > { %s1527_s8 = scalar_select %p1295_p11, 1, 0 }
  0x1a   : > { %s1304_s10 = sshll.u32 %s1512_s9, 3  ;;  %s1307_s11 = sshll.u32 %s1183_s22, 7 }
  0x1b   : > { %1528 = sst [smem:[#allocation19_spill]] %s1527_s8  ;;  %p1311_p0 = pnand %p922_p13, %p1276_p4 }
  0x1c   : > { %s242_s13 = sand.u32 1, %s1187_s23   ;;  %s1530_s1 = sld [smem:[#allocation20_spill]] }
  0x1d   : > { %s246_s17 = scalar_lea.vmem [#allocation5], %s1304_s10  ;;  %p839_p1 = scmp.ge.s32.totalorder %s1187_s23, 1 }
  0x1e   : > { %s253_s25 = sshll.u32 %s246_s17, 4  ;;  %p290_p2 = scmp.lt.s32.totalorder %s1187_s23, 3  ;;  %s254_s25 = int_to_ptr.vmem [resolvable:$true] %s253_s25 }
  0x1f   : > { %s1323_s27 = scalar_lea.sflag [#allocation6], %s242_s13  ;;  %p991_p3 = pneg %p1311_p0 }
  0x20   : > { %s1002_s28 = scalar_lea.vmem %s254_s25, 128  ;;  %s1189_s29 = smov [#allocation5]  }
  0x21   : > { %p1003_p4 = scmp.ne.s32.totalorder %s254_s25, %s1002_s28  ;;  %s1007_s9 = sshll.u32 %s1189_s29, 4  ;;  %s1008_s9 = int_to_ptr.vmem [resolvable:$false] %s1007_s9 }
  0x22   : > { %s252_s16 = scalar_lea.hbm %s1530_s1, %s1307_s11  ;;  %s1009_s14 = scalar_lea.vmem %s1008_s9, 256 }
  0x23   : > { %p1005_p5 = pnand %p1003_p4, %p991_p3  ;;  %p1010_p7 = scmp.lt.s32.totalorder %s254_s25, %s1008_s9 }
  0x24   : > { %p1011_p10 = scmp.lt.s32.totalorder %s1009_s14, %s1002_s28 }
  0x25   : > { %p1006_p6 = pneg %p1005_p5 }
  0x26   : > { %p1012_p13 = por %p1011_p10, %p1010_p7 }
  0x28   : > { %p1013_p12 = pnand %p1012_p13, %p1006_p6 }
  0x2a   : > { %1016 = shalt.err (!%p1013_p12)
}
  0x2b   : > { %s1517_s15 = smov 64   ;;  %s1191_s13 = smov 4  }
  0x2c   : > { %911 = dma.hbm_to_vmem [thread:$0]  (!%p1311_p0), %s252_s16, 128, %s254_s25, %s1323_s27, %s1517_s15, %s1517_s15, %s1191_s13  }
  0x2d   : > { %p1340_p4 = pnand %p839_p1, %p290_p2  ;;  %s231_s29 = scalar_lea.hbm %s1506_s0, %s1307_s11 }
  0x2e   : > { %s224_s14 = scalar_lea.vmem [#allocation2], %s1304_s10  ;;  %s273_s7 = scalar_lea.hbm %s1508_s2, %s1307_s11 }
  0x2f   : > { %s232_s1 = sshll.u32 %s224_s14, 4  ;;  %s1532_s8 = sand.u32 1, %s1175_s20   ;;  %s233_s1 = int_to_ptr.vmem [resolvable:$true] %s232_s1 }
  0x30   : > { %s221_s18 = scalar_lea.sflag [#allocation3], %s1532_s8  ;;  %s1030_s16 = scalar_lea.vmem %s233_s1, 128 }
  0x31   : > { %p1031_p12 = scmp.ne.s32.totalorder %s233_s1, %s1030_s16  ;;  %s1192_s25 = smov [#allocation2]  }
  0x32   : > { %s1035_s15 = sshll.u32 %s1192_s25, 4  ;;  %s1036_s15 = int_to_ptr.vmem [resolvable:$false] %s1035_s15 }
  0x33   : > { %p1033_p1 = pnand %p1031_p12, %p991_p3  ;;  %s1037_s17 = scalar_lea.vmem %s1036_s15, 256 }
  0x34   : > { %p1038_p5 = scmp.lt.s32.totalorder %s233_s1, %s1036_s15  ;;  %p1039_p6 = scmp.lt.s32.totalorder %s1037_s17, %s1030_s16 }
  0x35   : > { %p1034_p2 = pneg %p1033_p1 }
  0x36   : > { %p1040_p7 = por %p1039_p6, %p1038_p5 }
  0x38   : > { %p1041_p10 = pnand %p1040_p7, %p1034_p2 }
  0x3a   : > { %1044 = shalt.err (!%p1041_p10)
}
  0x3b   : > { %s1533_s22 = smov 64   ;;  %s267_s26 = scalar_lea.vmem [#allocation7], %s1304_s10 }
  0x3c   : > { %908 = dma.hbm_to_vmem [thread:$0]  (!%p1311_p0), %s231_s29, 128, %s233_s1, %s221_s18, %s1533_s22, %s1533_s22, %s1191_s13  }
  0x3d   : > { %s274_s8 = sshll.u32 %s267_s26, 4  ;;  %s1193_s15 = smov [#allocation7]   ;;  %s275_s8 = int_to_ptr.vmem [resolvable:$true] %s274_s8 }
  0x3e   : > { %s1058_s28 = scalar_lea.vmem %s275_s8, 128  ;;  %s1063_s14 = sshll.u32 %s1193_s15, 4  ;;  %s1064_s14 = int_to_ptr.vmem [resolvable:$false] %s1063_s14 }
  0x3f   : > { %p1059_p13 = scmp.ne.s32.totalorder %s275_s8, %s1058_s28  ;;  %s1065_s16 = scalar_lea.vmem %s1064_s14, 256 }
  0x40   : > { %p1066_p2 = scmp.lt.s32.totalorder %s275_s8, %s1064_s14  ;;  %p1067_p5 = scmp.lt.s32.totalorder %s1065_s16, %s1058_s28 }
  0x41   : > { %p1061_p12 = pnand %p1059_p13, %p991_p3 }
  0x42   : > { %p1068_p6 = por %p1067_p5, %p1066_p2 }
  0x43   : > { %p1062_p1 = pneg %p1061_p12 }
  0x45   : > { %p1069_p7 = pnand %p1068_p6, %p1062_p1 }
  0x47   : > { %1072 = shalt.err (!%p1069_p7)
}
  0x48   : > { %914 = dma.hbm_to_vmem [thread:$0]  (!%p1311_p0), %s273_s7, 128, %s275_s8, %s1323_s27, %s1533_s22, %s1533_s22, %s1191_s13  }
  0x49   : > { %294 = sbr.rel (%p1340_p4) target bundleno = 813 (0x32d), region = 36  ;;  %s1381_s10 = sand.u32 (!%p1340_p4), 1, %s1171_s19  }
  0x4a   : > { %s1384_s12 = sshll.u32 (!%p1340_p4), %s1381_s10, 3  ;;  %s297_s29 = scalar_lea.sflag (!%p1340_p4), [#allocation3], %s1381_s10 }
  0x4b   : > { %s300_s25 = scalar_lea.vmem (!%p1340_p4), [#allocation2], %s1384_s12 }
  0x4e   : > { %1150 = dma.done.wait (%p1284_p8), %s297_s29, 128  }
  0x4f   : > { %1152 = vsyncadd (%p1284_p8), %s297_s29, 4294967168  ;;  %s305_s7 = sand.u32 1, %s1264_s24   ;;  %s309_s27 = scalar_lea.vmem [#allocation5], %s1384_s12 }
  0x50   : > { %s306_s11 = scalar_lea.sflag [#allocation6], %s305_s7 }
  0x51   : > { %1154 = dma.done.wait (%p1284_p8), %s306_s11, 256  }
  0x52   : > { %1156 = vsyncadd (%p1284_p8), %s306_s11, 4294967040  ;;  %v1194_v0 = vmov 0.0   ;;  %vm1195_vm0 = vmmov 0   ;;  %vm382_vm1 = vcmask 523264   ;;  %v380_v1 = vld [vmem:[%s309_s27] sm:$0xf]  ;;  %v481_v9 = vlaneseq }
  0x53   : > { %871 = vmatprep.subr.bf16.mxu0 %v1194_v0  ;;  %877 = vmatprep.subr.bf16.mxu1 %v1194_v0  ;;  %v381_v2 = vld [vmem:[%s309_s27 + $0x4] sm:$0xf]  ;;  %v387_v3 = vsel %vm382_vm1, %v380_v1, 0  ;;  %v376_v5 = vld [vmem:[%s300_s25] sm:$0xf]  ;;  %s845_s24 = sshll.u32 %s1179_s21, 1 }
  0x54   : > { %873 = vmatprep.mubr.msk.bf16.mxu0 %vm1195_vm0, %v1194_v0  ;;  %879 = vmatprep.mubr.msk.bf16.mxu1 %vm1195_vm0, %v1194_v0  ;;  %v433_v4 = vsel %vm382_vm1, %v381_v2, 0  ;;  %v377_v6 = vld [vmem:[%s300_s25 + $0x4] sm:$0xf]  ;;  %v378_v7 = vmul.bf16 1040203264, %v376_v5  ;;  %p368_p8 = scmp.lt.s32.totalorder %s845_s24, 3 }
  0x55   : > { %872 = vmatpush3.bf16.xpose.msra.mxu0 %v387_v3  ;;  %878 = vmatpush3.bf16.xpose.msra.mxu1 %v433_v4  ;;  %v379_v8 = vmul.bf16 1040203264, %v377_v6  ;;  %v482_v12 = vshrl.u32 %v481_v9, 7  ;;  %v1196_v14 = vmov 0   ;;  %vm493_vm6 = vcmask 64512   ;;  %s318_s17 = scalar_lea.vmem [#allocation7], %s1384_s12 }
  0x56   : > { %883 = vmatprep.subr.bf16.mxu0 %v1194_v0  ;;  %889 = vmatprep.subr.bf16.mxu1 %v1194_v0  ;;  %s1546_s24 = smov (!%p368_p8, %s845_s24), 3  ;;  %vm523_vm7 = vcmask 1043456   ;;  %v518_v41 = vld [vmem:[%s318_s17] sm:$0xf]  ;;  %v519_v42 = vld [vmem:[%s318_s17 + $0x4] sm:$0xf] }
  0x57   : > { %s370_s9 = scalar_lea.vmem %s1509_s3, %s1546_s24  ;;  %v483_v13 = vsub.s32 0, %v482_v12  ;;  %v525_v43 = vsel %vm523_vm7, %v518_v41, 0  ;;  %v571_v44 = vsel %vm523_vm7, %v519_v42, 0  ;;  %vm615_vm8 = vcmask 60416   ;;  %s363_s22 = scalar_lea.vmem [#allocation9], %s1384_s12 }
  0x58   : > { %v475_v10 = vld [vmem:[%s370_s9] sm:$0x1]  ;;  %v476_v11 = vld [vmem:[%s370_s9 + $0x1] sm:$0x1]  ;;  %s862_s26 = sshll.u32 %s1179_s21, 7  ;;  %s655_s14 = sshll.u32 %s363_s22, 4  ;;  %s1424_s14 = int_to_ptr.vmem [resolvable:$true] %s655_s14 }
  0x59   : > { %vm477_vm2 = vcmp.ne.s32.totalorder %v475_v10, 0  ;;  %vm478_vm3 = vcmp.ne.s32.totalorder %v476_v11, 0  ;;  %s1422_s15 = scalar_lea.hbm %s1511_s5, %s862_s26  ;;  %s624_s16 = scalar_lea.sflag [#allocation10], %s1381_s10 }
  0x5a   : > { %v479_v15 = vsel %vm477_vm2, 1, %v1196_v14  ;;  %v480_v16 = vsel %vm478_vm3, 1, %v1196_v14  ;;  %s1073_s1 = scalar_lea.vmem %s1424_s14, 128  ;;  %s1197_s18 = smov [#allocation9]  }
  0x5b   : > { %v484_v17 = vrot.slane %v479_v15, %v483_v13  ;;  %v488_v18 = vrot.slane %v480_v16, %v483_v13  ;;  %p1074_p0 = scmp.ne.s32.totalorder %s1424_s14, %s1073_s1  ;;  %s1077_s12 = sshll.u32 %s1197_s18, 4  ;;  %s1078_s12 = int_to_ptr.vmem [resolvable:$false] %s1077_s12 }
  0x5c   : > { %874 = vmatmul.mubr.msk.bf16.vlgmr.msra.gmra.mxu0 %vm382_vm1, %v378_v7  ;;  %880 = vmatmul.mubr.msk.bf16.vlgmr.msra.gmra.mxu1 %vm382_vm1, %v379_v8  ;;  %s1079_s29 = scalar_lea.vmem %s1078_s12, 256  ;;  %p1080_p10 = scmp.lt.s32.totalorder %s1424_s14, %s1078_s12 }
  0x5d   : > { %885 = vmatprep.mubr.msk.bf16.mxu0 %vm1195_vm0, %v1194_v0  ;;  %891 = vmatprep.mubr.msk.bf16.mxu1 %vm1195_vm0, %v1194_v0  ;;  %vm489_vm4 = vcmp.eq.s32.totalorder %v484_v17, 1  ;;  %vm490_vm5 = vcmp.eq.s32.totalorder %v488_v18, 1  ;;  %p1075_p3 = pnand %p1074_p0, %p1288_p9  ;;  %p1081_p13 = scmp.lt.s32.totalorder %s1079_s29, %s1073_s1 }
  0x5e   : > { %884 = vmatpush3.bf16.msra.mxu0 %v525_v43  ;;  %890 = vmatpush3.bf16.msra.mxu1 %v571_v44 }
  0x5f   : > { %p1076_p4 = pneg %p1075_p3  ;;  %p1082_p12 = por %p1081_p13, %p1080_p10 }
  0x61   : > { %p1083_p1 = pnand %p1082_p12, %p1076_p4 }
 0x11c   : > { %v423_v19 = vpop.f32.mrf.mxu0  ;;  %v469_v20 = vpop.f32.mrf.mxu1 }
 0x11d   : > { %v491_v21 = vsel %vm489_vm4, -1e+09, %v423_v19  ;;  %v492_v22 = vsel %vm490_vm5, -1e+09, %v469_v20 }
 0x11e   : > { %v875_v23 = vpop.f32.mrf.mxu0  ;;  %v881_v24 = vpop.f32.mrf.mxu1  ;;  %v494_v25 = vsel %vm493_vm6, %v491_v21, -inf  ;;  %v497_v28 = vsel %vm493_vm6, %v492_v22, -inf }
 0x11f   : > { %495 = vmax.xlane.f32.xlu0 %v494_v25 }
 0x120   : > { %v426_v26 = vpop.f32.mrf.mxu0  ;;  %v472_v27 = vpop.f32.mrf.mxu1 }
 0x122   : > { %v876_v29 = vpop.f32.mrf.mxu0  ;;  %v882_v30 = vpop.f32.mrf.mxu1 }
 0x123   : > { %498 = vmax.xlane.f32.xlu0 %v497_v28 }
 0x1a8   : > { %v496_v31 = vpop.xlane.xlu0 %495 }
 0x1a9   : > { %v500_v32 = vsub.f32 %v491_v21, %v496_v31 }
 0x1ab   : > { %v502_v33 = vmul.f32 1.442695, %v500_v32 }
 0x1ac   : > { %v499_v34 = vpop.xlane.xlu0 %498 }
 0x1ad   : > { %981 = vpow2.f32 %v502_v33  ;;  %v501_v35 = vsub.f32 %v492_v22, %v499_v34 }
 0x1af   : > { %v504_v36 = vmul.f32 1.442695, %v501_v35 }
 0x1b1   : > { %983 = vpow2.f32 %v504_v36 }
 0x1ba   : > { %v982_v37 = vpop.eup %981 }
 0x1bb   : > { %v506_v38 = vsel %vm493_vm6, %v982_v37, 0.0 }
 0x1bc   : > { %507 = vadd.xlane.f32.xlu1 %v506_v38 }
 0x1be   : > { %v984_v39 = vpop.eup %983 }
 0x1bf   : > { %v509_v40 = vsel %vm493_vm6, %v984_v39, 0.0 }
 0x1c0   : > { %510 = vadd.xlane.f32.xlu1 %v509_v40 }
 0x245   : > { %v508_v45 = vpop.xlane.xlu1 %507 }
 0x246   : > { %985 = vrcp.f32 %v508_v45 }
 0x249   : > { %v511_v46 = vpop.xlane.xlu1 %510 }
 0x24a   : > { %987 = vrcp.f32 %v511_v46 }
 0x253   : > { %v986_v47 = vpop.eup %985 }
 0x254   : > { %v514_v48 = vmul.f32 %v986_v47, %v982_v37 }
 0x256   : > { %v516_v49 = vpack.c.bf16 %v514_v48, %v514_v48 }
 0x257   : > { %v988_v50 = vpop.eup %987 }
 0x258   : > { %886 = vmatmul.mubr.msk.bf16.vlgmr.msra.gmra.mxu0 %vm493_vm6, %v516_v49  ;;  %v515_v51 = vmul.f32 %v988_v50, %v984_v39  ;;  %616 = vst.msk [vmem:[%s363_s22] sm:$0xf] %vm615_vm8, %v516_v49 }
 0x25a   : > { %v517_v52 = vpack.c.bf16 %v515_v51, %v515_v51 }
 0x25c   : > { %892 = vmatmul.mubr.msk.bf16.vlgmr.msra.gmra.mxu1 %vm493_vm6, %v517_v52  ;;  %617 = vst.msk [vmem:[%s363_s22 + $0x4] sm:$0xf] %vm615_vm8, %v517_v52 }
 0x25d   : > { %1086 = shalt.err (!%p1083_p1)
}
 0x25e   : > { %s1087_s25 = scalar_lea.hbm %s1422_s15, 128  ;;  %s1091_s27 = scalar_lea.hbm %s1511_s5, 256 }
 0x25f   : > { %p1088_p2 = scmp.ne.s32.totalorder %s1422_s15, %s1087_s25  ;;  %p1092_p7 = scmp.lt.s32.totalorder %s1422_s15, %s1511_s5 }
 0x260   : > { %p1093_p8 = scmp.lt.s32.totalorder %s1091_s27, %s1087_s25 }
 0x261   : > { %p1089_p5 = pnand %p1088_p2, %p1288_p9 }
 0x262   : > { %p1094_p0 = por %p1093_p8, %p1092_p7 }
 0x263   : > { %p1090_p6 = pneg %p1089_p5 }
 0x265   : > { %p1095_p3 = pnand %p1094_p0, %p1090_p6 }
 0x267   : > { %1098 = shalt.err (!%p1095_p3)
}
 0x268   : > { %s1198_s13 = smov 64   ;;  %s1199_s9 = smov 4  }
 0x269   : > { %902 = dma.vmem_to_hbm [thread:$0]  (%p1288_p9), %s1424_s14, 128, %s1422_s15, %s624_s16, %s1198_s13, %s1198_s13, %s1199_s9  }
 0x26a   : > { %s843_s17 = sshll.u32 %s1381_s10, 4  ;;  %s861_s8 = sshll.u32 %s1179_s21, 8 }
 0x26b   : > { %s356_s22 = scalar_lea.vmem [#allocation8], %s843_s17  ;;  %s1457_s18 = scalar_lea.hbm %s1510_s4, %s861_s8 }
 0x26c   : > { %s638_s26 = sshll.u32 %s356_s22, 4  ;;  %s619_s21 = scalar_lea.sflag [#allocation4], %s1381_s10  ;;  %s1452_s26 = int_to_ptr.vmem [resolvable:$true] %s638_s26 }
 0x26d   : > { %s1099_s15 = scalar_lea.vmem %s1452_s26, 256  ;;  %s1200_s14 = smov [#allocation8]  }
 0x26e   : > { %p1100_p4 = scmp.ne.s32.totalorder %s1452_s26, %s1099_s15  ;;  %s1103_s16 = sshll.u32 %s1200_s14, 4  ;;  %s1104_s16 = int_to_ptr.vmem [resolvable:$false] %s1103_s16 }
 0x26f   : > { %s1105_s12 = scalar_lea.vmem %s1104_s16, 512  ;;  %p1106_p12 = scmp.lt.s32.totalorder %s1452_s26, %s1104_s16 }
 0x270   : > { %p1101_p10 = pnand %p1100_p4, %p1288_p9  ;;  %p1107_p1 = scmp.lt.s32.totalorder %s1105_s12, %s1099_s15 }
 0x272   : > { %p1102_p13 = pneg %p1101_p10  ;;  %p1108_p2 = por %p1107_p1, %p1106_p12 }
 0x274   : > { %p1109_p5 = pnand %p1108_p2, %p1102_p13 }
 0x318   : > { %v561_v53 = vpop.f32.mrf.mxu0 }
 0x319   : > { %613 = vst.msk [vmem:[%s356_s22] sm:$0xff] %vm382_vm1, %v561_v53 }
 0x31a   : > { %v887_v54 = vpop.f32.mrf.mxu0 }
 0x31c   : > { %v564_v55 = vpop.f32.mrf.mxu0  ;;  %v607_v56 = vpop.f32.mrf.mxu1 }
 0x31d   : > { %614 = vst.msk [vmem:[%s356_s22 + $0x8] sm:$0xff] %vm382_vm1, %v607_v56 }
 0x31e   : > { %v888_v57 = vpop.f32.mrf.mxu0  ;;  %v893_v58 = vpop.f32.mrf.mxu1 }
 0x31f   : > { %1112 = shalt.err (!%p1109_p5)
}
 0x320   : > { %s1113_s29 = scalar_lea.hbm %s1457_s18, 256  ;;  %s1117_s11 = scalar_lea.hbm %s1510_s4, 512 }
 0x321   : > { %p1114_p6 = scmp.ne.s32.totalorder %s1457_s18, %s1113_s29  ;;  %p1118_p0 = scmp.lt.s32.totalorder %s1457_s18, %s1510_s4 }
 0x322   : > { %p1119_p3 = scmp.lt.s32.totalorder %s1117_s11, %s1113_s29 }
 0x323   : > { %p1115_p7 = pnand %p1114_p6, %p1288_p9 }
 0x324   : > { %p1120_p4 = por %p1119_p3, %p1118_p0 }
 0x325   : > { %p1116_p8 = pneg %p1115_p7 }
 0x327   : > { %p1121_p10 = pnand %p1120_p4, %p1116_p8 }
 0x329   : > { %1124 = shalt.err (!%p1121_p10)
}
 0x32a   : > { %s1201_s30 = smov 128   ;;  %s1202_s13 = smov 8   ;;  %v610_v59 = vpop.f32.mrf.mxu1 }
 0x32b   : > { %901 = dma.vmem_to_hbm [thread:$0]  (%p1288_p9), %s1452_s26, 256, %s1457_s18, %s619_s21, %s1201_s30, %s1201_s30, %s1202_s13  }
 0x32c   : > { %v894_v60 = vpop.f32.mrf.mxu1 }
 0x32d PF: > { %s1534_s9 = sld [smem:[#allocation15_spill]]  ;;  %p1536_p13 = scmp.ge.s32.totalorder %s1187_s23, 2 }
 0x32f   : > { %p916_p12 = pnand %p1536_p13, %p1295_p11 }
 0x331   : > { %p917_p1 = pneg %p916_p12 }
 0x333   : > { %s670_s22 = sand.u32 1, %s1534_s9  }
 0x334   : > { %s671_s8 = scalar_lea.sflag [#allocation4], %s670_s22 }
 0x335   : > { %1158 = dma.done.wait (%p917_p1), %s671_s8, 256  }
 0x336   : > { %1160 = vsyncadd (%p917_p1), %s671_s8, 4294967040  ;;  %s680_s28 = scalar_lea.sflag [#allocation10], %s670_s22 }
 0x337   : > { %1162 = dma.done.wait (%p917_p1), %s680_s28, 128  }
 0x338   : > { %1164 = vsyncadd (%p917_p1), %s680_s28, 4294967168  ;;  %s28_s23 = sadd.s32 1, %s1187_s23   ;;  %s1537_s6 = sld [smem:[#allocation18_spill]] }
 0x339   : > { %p25_p9 = scmp.ge.s32.totalorder %s28_s23, 4   ;;  %s1538_s21 = sld [smem:[#allocation16_spill]] }
 0x33a   : > { %s1539_s22 = sld [smem:[#allocation17_spill]]  ;;  %s1540_s18 = smov %s1171_s19 }
 0x33b   : > { %s1541_s19 = smov %s1175_s20  ;;  %27 = sbr.rel (!%p25_p9) target bundleno = 12 (0xc), region = 125 }
 0x33e   : > { %s1542_s20 = smov %s1537_s6 }
 0x340   :  { %685 = vsyncpa [#allocation3], 1 }
 0x341   :  { %687 = vsyncpa [#allocation3 + $0x1], 1 }
 0x342   :  { %688 = vsyncpa [#allocation6], 1 }
 0x343   :  { %690 = vsyncpa [#allocation6 + $0x1], 1 }
 0x344   :  { %691 = vsyncpa [#allocation4], 1 }
 0x345   :  { %693 = vsyncpa [#allocation4 + $0x1], 1 }
 0x346   :  { %694 = vsyncpa [#allocation10], 1 }
 0x347   :  { %696 = vsyncpa [#allocation10 + $0x1], 1 }

</bundles_post_ra>
